<compile_context>
chip_gen: v7x
topology: tpu7x:2x2x1
jax: 0.10.0
libtpu: 0.0.40
codegen_flags: <defaults>
</compile_context>

<pallas_src>
import functools

import jax
import jax.numpy as jnp
from jax.experimental import pallas as pl
from jax.experimental.pallas import tpu as pltpu


def _round_up(x, m):
    return (x + m - 1) // m * m


def _lane_pad(d):
    # <=128 -> 128; otherwise multiples of 256 so the 256x256 MXU (v6e/v7x) is fully fed.
    return 128 if d <= 128 else _round_up(d, 256)


def _vmem_capacity_bytes():
    try:
        return int(pltpu.get_tpu_info().vmem_capacity_bytes)
    except Exception:
        return 64 << 20  # conservative default (v7x per-core VMEM)


def _maybe_single_buffered(shape, index_map):
    # Resident operand (constant index_map): one buffer is enough; fall back to the
    # default double-buffered spec if this Pallas version rejects the kwarg.
    try:
        return pl.BlockSpec(shape, index_map, pipeline_mode=pl.Buffered(1))
    except TypeError:
        return pl.BlockSpec(shape, index_map)


def _ffn_kernel(x_ref, w1_ref, b1_ref, w2_ref, b2_ref, o_ref, acc_ref):
    # x_ref:  (tm, E_p)  bf16 input row tile      (constant across the F axis)
    # w1_ref: (E_p, tf)  bf16 linear1 weight chunk
    # b1_ref: (1, tf)    f32  linear1 bias chunk
    # w2_ref: (tf, E_p)  bf16 linear2 weight chunk
    # b2_ref: (1, E_p)   f32  linear2 bias        (resident, single-buffered)
    # o_ref:  (tm, E_p)  output tile in activation dtype
    # acc_ref:(tm, E_p)  f32 scratch accumulator
    k = pl.program_id(1)

    @pl.when(k == 0)
    def _():
        acc_ref[...] = jnp.zeros_like(acc_ref)

    # Linear1 chunk on the MXU (f32 accumulation), bias + ReLU in f32 on the VPU.
    h = jnp.dot(x_ref[...], w1_ref[...], preferred_element_type=jnp.float32)
    h = jnp.maximum(h + b1_ref[...], 0.0)
    # dropout (eval mode) -> identity

    # Linear2 partial product accumulated in f32.
    acc_ref[...] += jnp.dot(h.astype(w2_ref.dtype), w2_ref[...],
                            preferred_element_type=jnp.float32)

    @pl.when(k == pl.num_programs(1) - 1)
    def _():
        # bias2; dropout (eval mode) -> identity; store in activation dtype.
        o_ref[...] = (acc_ref[...] + b2_ref[...]).astype(o_ref.dtype)


@functools.partial(jax.jit, static_argnames=("block_rows", "block_ff"))
def feed_forward(x, w1, b1, w2, b2, *, block_rows=None, block_ff=1024):
    """x: (B, S, E). w1: (E, F) = linear1.weight.T, b1: (F,), w2: (F, E), b2: (E,)."""
    B, S, E = x.shape
    F = w1.shape[1]
    M = B * S
    out_dtype = x.dtype

    vmem_cap = _vmem_capacity_bytes()
    if block_rows is None:
        # 512-row tiles on 128 MiB parts (v5e/v6e); 256 on v7x's 64 MiB per-core VMEM.
        block_rows = 512 if vmem_cap >= (100 << 20) else 256

    # Lane-dense padding of the minor dims.
    E_p = _lane_pad(E)
    F_p = _lane_pad(F)

    # F-streaming chunk width (multiple of the lane width, divides F_p).
    if F_p > block_ff:
        tf = block_ff
        F_p = _round_up(F_p, tf)
    else:
        tf = F_p

    # Row tile: large tiles for real workloads, whole problem in one step when tiny.
    if M >= block_rows:
        tm = block_rows
        if M >= 512 and M // tm < 2:
            tm = 256  # keep both TensorCores busy under megacore sharding
        M_p = _round_up(M, tm)
    else:
        M_p = _round_up(M, 8)
        tm = M_p

    # bf16 matmul operands; zero-pad only when ragged so padded rows/cols are exact no-ops.
    x2d = x.reshape(M, E).astype(jnp.bfloat16)
    if (M_p, E_p) != (M, E):
        x2d = jnp.pad(x2d, ((0, M_p - M), (0, E_p - E)))
    w1_p = w1.astype(jnp.bfloat16)
    if (E_p, F_p) != (E, F):
        w1_p = jnp.pad(w1_p, ((0, E_p - E), (0, F_p - F)))
    w2_p = w2.astype(jnp.bfloat16)
    if (F_p, E_p) != (F, E):
        w2_p = jnp.pad(w2_p, ((0, F_p - F), (0, E_p - E)))
    b1_p = b1.astype(jnp.float32)
    if F_p != F:
        b1_p = jnp.pad(b1_p, (0, F_p - F))
    b1_p = b1_p.reshape(1, F_p)
    b2_p = b2.astype(jnp.float32)
    if E_p != E:
        b2_p = jnp.pad(b2_p, (0, E_p - E))
    b2_p = b2_p.reshape(1, E_p)

    grid_m = M_p // tm
    grid_f = F_p // tf
    out_bytes = jnp.dtype(out_dtype).itemsize

    # Per-step VMEM budget: double-buffered streamed operands, single-buffered b2,
    # f32 accumulator scratch, and the in-flight hidden chunk; plus slack for Mosaic
    # internal scratch.  Capped at ~80% of the per-generation VMEM capacity.
    needed = (tm * E_p * 2 * 2            # x tile (bf16), 2 buffers
              + E_p * tf * 2 * 2          # W1 chunk (bf16), 2 buffers
              + tf * E_p * 2 * 2          # W2 chunk (bf16), 2 buffers
              + 8 * tf * 4 * 2            # b1 chunk (sublane-padded f32), 2 buffers
              + 8 * E_p * 4               # b2 (single-buffered)
              + tm * E_p * out_bytes * 2  # out tile, 2 buffers
              + tm * E_p * 4              # f32 accumulator scratch
              + tm * tf * (4 + 2))        # hidden chunk: f32 + bf16 copy
    vmem_limit = int(min(max(needed + (4 << 20), 16 << 20), (vmem_cap * 4) // 5))

    cost = pl.CostEstimate(
        flops=4 * M_p * E_p * F_p,
        transcendentals=0,
        bytes_accessed=(M_p * E_p * 2                        # x in (bf16)
                        + grid_m * 2 * E_p * F_p * 2          # streamed weights, re-read per row tile
                        + (F_p + E_p) * 4                     # biases (f32)
                        + M_p * E_p * out_bytes),             # out (activation dtype)
    )

    out2d = pl.pallas_call(
        _ffn_kernel,
        out_shape=jax.ShapeDtypeStruct((M_p, E_p), out_dtype),
        grid_spec=pltpu.PrefetchScalarGridSpec(
            num_scalar_prefetch=0,
            grid=(grid_m, grid_f),
            in_specs=[
                pl.BlockSpec((tm, E_p), lambda i, k: (i, 0)),   # x row tile (constant over k)
                pl.BlockSpec((E_p, tf), lambda i, k: (0, k)),   # W1 chunk
                pl.BlockSpec((1, tf), lambda i, k: (0, k)),     # b1 chunk
                pl.BlockSpec((tf, E_p), lambda i, k: (k, 0)),   # W2 chunk
                _maybe_single_buffered((1, E_p), lambda i, k: (0, 0)),  # b2 (resident)
            ],
            out_specs=pl.BlockSpec((tm, E_p), lambda i, k: (i, 0)),
            scratch_shapes=[pltpu.VMEM((tm, E_p), jnp.float32)],
        ),
        compiler_params=pltpu.CompilerParams(
            dimension_semantics=("parallel", "arbitrary"),
            vmem_limit_bytes=vmem_limit,
        ),
        cost_estimate=cost,
    )(x2d, w1_p, b1_p, w2_p, b2_p)

    if (M_p, E_p) != (M, E):
        out2d = out2d[:M, :E]
    return out2d.reshape(B, S, E)


def _reference(x, w1, b1, w2, b2):
    h = jnp.maximum(jnp.einsum("bse,ef->bsf", x, w1) + b1, 0.0)
    return jnp.einsum("bsf,fe->bse", h, w2) + b2


def _make_params(key, E, F):
    k1, kb1, k2, kb2 = jax.random.split(key, 4)
    # Deterministic init mimicking nn.Linear's uniform(-1/sqrt(fan_in), 1/sqrt(fan_in)).
    bound1 = 1.0 / (E ** 0.5)
    w1 = jax.random.uniform(k1, (E, F), jnp.float32, -bound1, bound1)   # linear1.weight.T
    b1 = jax.random.uniform(kb1, (F,), jnp.float32, -bound1, bound1)
    bound2 = 1.0 / (F ** 0.5)
    w2 = jax.random.uniform(k2, (F, E), jnp.float32, -bound2, bound2)   # linear2.weight.T
    b2 = jax.random.uniform(kb2, (E,), jnp.float32, -bound2, bound2)
    return w1, b1, w2, b2


if __name__ == "__main__":
    key = jax.random.PRNGKey(0)

    # Case 1: small shapes consistent with the module: batch=2, seq=8, embed_dim=32, ff_dim=128.
    B, S, E, F = 2, 8, 32, 128
    kx, kp = jax.random.split(key)
    x = jax.random.normal(kx, (B, S, E), dtype=jnp.float32)
    w1, b1, w2, b2 = _make_params(kp, E, F)

    out = jax.block_until_ready(feed_forward(x, w1, b1, w2, b2))
    ref = _reference(x, w1, b1, w2, b2)
    assert out.shape == (B, S, E) and out.dtype == x.dtype
    # bf16 matmul operands with f32 accumulation -> loosened tolerance vs f32 reference.
    assert jnp.allclose(out, ref, atol=5e-2, rtol=5e-2), "mismatch vs reference (small)"

    # Case 2: exercises multi-step grid on both axes (row tiling + F streaming) and lane padding.
    B2, S2, E2, F2 = 2, 256, 192, 2048
    kx2, kp2 = jax.random.split(jax.random.PRNGKey(1))
    x2 = jax.random.normal(kx2, (B2, S2, E2), dtype=jnp.float32)
    p2 = _make_params(kp2, E2, F2)

    out2 = jax.block_until_ready(feed_forward(x2, *p2))
    ref2 = _reference(x2, *p2)
    assert out2.shape == (B2, S2, E2)
    assert jnp.allclose(out2, ref2, atol=1e-1, rtol=1e-1), "mismatch vs reference (tiled)"

    print("KERNEL_OK")
</pallas_src>

<mosaic_0001>
module attributes {stable_mosaic.version = 11 : i64} {
  func.func @_ffn_kernel(%arg0: i32, %arg1: i32, %arg2: memref<16x128xbf16, #tpu.memory_space<vmem>>, %arg3: memref<128x128xbf16, #tpu.memory_space<vmem>>, %arg4: memref<1x128xf32, #tpu.memory_space<vmem>>, %arg5: memref<128x128xbf16, #tpu.memory_space<vmem>>, %arg6: memref<1x128xf32, #tpu.memory_space<vmem>>, %arg7: memref<16x128xf32, #tpu.memory_space<vmem>>, %arg8: memref<16x128xf32, #tpu.memory_space<vmem>>) attributes {dimension_semantics = [#tpu.dimension_semantics<parallel>, #tpu.dimension_semantics<arbitrary>], iteration_bounds = array<i64: 1, 1>, scalar_prefetch = 0 : i64, scratch_operands = 1 : i64, tpu.core_type = #tpu.core_type<tc>, window_params = [{transform_indices = @transform_0, window_bounds = array<i64: 16, 128>}, {transform_indices = @transform_1, window_bounds = array<i64: 128, 128>}, {transform_indices = @transform_2, window_bounds = array<i64: 1, 128>}, {transform_indices = @transform_3, window_bounds = array<i64: 128, 128>}, {pipeline_mode = #tpu.pipeline_mode<synchronous>, transform_indices = @transform_4, window_bounds = array<i64: 1, 128>}, {transform_indices = @transform_5, window_bounds = array<i64: 16, 128>}]} {
    %c0_i32 = arith.constant 0 : i32
    %0 = arith.cmpi eq, %arg1, %c0_i32 : i32
    %1 = arith.extui %0 : i1 to i32
    %c0_i32_0 = arith.constant 0 : i32
    %2 = arith.cmpi ne, %1, %c0_i32_0 : i32
    scf.if %2 {
      %cst_16 = arith.constant 0.000000e+00 : f32
      %20 = vector.broadcast %cst_16 : f32 to vector<16x128xf32>
      %c0_17 = arith.constant 0 : index
      %c0_18 = arith.constant 0 : index
      %21 = vector.load %arg8[%c0_17, %c0_18] : memref<16x128xf32, #tpu.memory_space<vmem>>, vector<16x128xf32>
      tpu.vector_store %arg8[%c0_17, %c0_18], %20 {strides = array<i32>} : memref<16x128xf32, #tpu.memory_space<vmem>>, vector<16x128xf32>,
    } else {
    }
    %c0 = arith.constant 0 : index
    %c0_1 = arith.constant 0 : index
    %3 = vector.load %arg2[%c0, %c0_1] : memref<16x128xbf16, #tpu.memory_space<vmem>>, vector<16x128xbf16>
    %c0_2 = arith.constant 0 : index
    %c0_3 = arith.constant 0 : index
    %4 = vector.load %arg3[%c0_2, %c0_3] : memref<128x128xbf16, #tpu.memory_space<vmem>>, vector<128x128xbf16>
    %cst = arith.constant dense<0.000000e+00> : vector<16x128xf32>
    %5 = tpu.matmul %3, %4, %cst {dimension_numbers = #tpu.dot_dimension_numbers<[1], [0], [0], [1], [0, 0, 1, 1], [], []>} : vector<16x128xbf16>, vector<128x128xbf16>, vector<16x128xf32> -> vector<16x128xf32>
    %c0_4 = arith.constant 0 : index
    %c0_5 = arith.constant 0 : index
    %6 = vector.load %arg4[%c0_4, %c0_5] : memref<1x128xf32, #tpu.memory_space<vmem>>, vector<1x128xf32>
    %7 = vector.broadcast %6 : vector<1x128xf32> to vector<16x128xf32>
    %8 = arith.addf %5, %7 : vector<16x128xf32>
    %cst_6 = arith.constant 0.000000e+00 : f32
    %9 = vector.broadcast %cst_6 : f32 to vector<16x128xf32>
    %10 = arith.maximumf %8, %9 : vector<16x128xf32>
    %c0_7 = arith.constant 0 : index
    %c0_8 = arith.constant 0 : index
    %11 = vector.load %arg8[%c0_7, %c0_8] : memref<16x128xf32, #tpu.memory_space<vmem>>, vector<16x128xf32>
    %12 = arith.truncf %10 : vector<16x128xf32> to vector<16x128xbf16>
    %c0_9 = arith.constant 0 : index
    %c0_10 = arith.constant 0 : index
    %13 = vector.load %arg5[%c0_9, %c0_10] : memref<128x128xbf16, #tpu.memory_space<vmem>>, vector<128x128xbf16>
    %cst_11 = arith.constant dense<0.000000e+00> : vector<16x128xf32>
    %14 = tpu.matmul %12, %13, %cst_11 {dimension_numbers = #tpu.dot_dimension_numbers<[1], [0], [0], [1], [0, 0, 1, 1], [], []>} : vector<16x128xbf16>, vector<128x128xbf16>, vector<16x128xf32> -> vector<16x128xf32>
    %15 = arith.addf %11, %14 : vector<16x128xf32>
    %c0_12 = arith.constant 0 : index
    %c0_13 = arith.constant 0 : index
    %16 = vector.load %arg8[%c0_12, %c0_13] : memref<16x128xf32, #tpu.memory_space<vmem>>, vector<16x128xf32>
    tpu.vector_store %arg8[%c0_12, %c0_13], %15 {strides = array<i32>} : memref<16x128xf32, #tpu.memory_space<vmem>>, vector<16x128xf32>,
    %c0_i32_14 = arith.constant 0 : i32
    %17 = arith.cmpi eq, %arg1, %c0_i32_14 : i32
    %18 = arith.extui %17 : i1 to i32
    %c0_i32_15 = arith.constant 0 : i32
    %19 = arith.cmpi ne, %18, %c0_i32_15 : i32
    scf.if %19 {
      %c0_16 = arith.constant 0 : index
      %c0_17 = arith.constant 0 : index
      %20 = vector.load %arg8[%c0_16, %c0_17] : memref<16x128xf32, #tpu.memory_space<vmem>>, vector<16x128xf32>
      %c0_18 = arith.constant 0 : index
      %c0_19 = arith.constant 0 : index
      %21 = vector.load %arg6[%c0_18, %c0_19] : memref<1x128xf32, #tpu.memory_space<vmem>>, vector<1x128xf32>
      %22 = vector.broadcast %21 : vector<1x128xf32> to vector<16x128xf32>
      %23 = arith.addf %20, %22 : vector<16x128xf32>
      %c0_20 = arith.constant 0 : index
      %c0_21 = arith.constant 0 : index
      %24 = vector.load %arg7[%c0_20, %c0_21] : memref<16x128xf32, #tpu.memory_space<vmem>>, vector<16x128xf32>
      tpu.vector_store %arg7[%c0_20, %c0_21], %23 {strides = array<i32>} : memref<16x128xf32, #tpu.memory_space<vmem>>, vector<16x128xf32>,
    } else {
    }
    return
  }
  func.func @transform_0(%arg0: i32, %arg1: i32) -> (i32, i32) {
    %c0_i32 = arith.constant 0 : i32
    %c0_i32_0 = arith.constant 0 : i32
    return %arg0, %c0_i32 : i32, i32
  }
  func.func @transform_1(%arg0: i32, %arg1: i32) -> (i32, i32) {
    %c0_i32 = arith.constant 0 : i32
    %c0_i32_0 = arith.constant 0 : i32
    return %c0_i32, %arg1 : i32, i32
  }
  func.func @transform_2(%arg0: i32, %arg1: i32) -> (i32, i32) {
    %c0_i32 = arith.constant 0 : i32
    %c0_i32_0 = arith.constant 0 : i32
    return %c0_i32, %arg1 : i32, i32
  }
  func.func @transform_3(%arg0: i32, %arg1: i32) -> (i32, i32) {
    %c0_i32 = arith.constant 0 : i32
    %c0_i32_0 = arith.constant 0 : i32
    return %arg1, %c0_i32 : i32, i32
  }
  func.func @transform_4(%arg0: i32, %arg1: i32) -> (i32, i32) {
    %c0_i32 = arith.constant 0 : i32
    %c0_i32_0 = arith.constant 0 : i32
    %c0_i32_1 = arith.constant 0 : i32
    return %c0_i32, %c0_i32_0 : i32, i32
  }
  func.func @transform_5(%arg0: i32, %arg1: i32) -> (i32, i32) {
    %c0_i32 = arith.constant 0 : i32
    %c0_i32_0 = arith.constant 0 : i32
    return %arg0, %c0_i32 : i32, i32
  }
}

</mosaic_0001>

<bundles_post_ra>
// kernel: feed_forward.1
= control target key start
LH: loop header
LB: loop body
LE: loop exit
PB: predicated region body
PF: predicated region fallthrough
CT: control target
= control target key end

     0   :  { %v377_v0 = vmov 0.0   ;;  %vm378_vm0 = vmmov 0   ;;  %s472_s1 = inlined_call_operand.vmem [shape: bf16[128,128], index: 1, kind: input, shape index: {}]   ;;  %s473_s3 = inlined_call_operand.vmem [shape: bf16[128,128], index: 3, kind: input, shape index: {}]   ;;  %s474_s0 = inlined_call_operand.vmem [shape: bf16[16,128], index: 0, kind: input, shape index: {}]   ;;  %s475_s2 = inlined_call_operand.vmem [shape: f32[1,128], index: 2, kind: input, shape index: {}]   ;;  %s476_s4 = inlined_call_operand.vmem [shape: f32[1,128], index: 4, kind: input, shape index: {}]   ;;  %s477_s5 = inlined_call_operand.vmem [shape: f32[16,128], index: 5, kind: output, shape index: {}]  }
   0x1   :  { %318 = vmatprep.subr.bf16.mxu0 %v377_v0  ;;  %v360_v1 = vld [vmem:[%s472_s1] sm:$0xff]   ;;  %334 = vmatprep.mubr.msk.bf16.mxu0 %vm378_vm0, %v377_v0  ;;  %v361_v2 = vld [vmem:[%s472_s1 + $0x8] sm:$0xff]   ;;  %v362_v3 = vld [vmem:[%s472_s1 + $0x10] sm:$0xff]  }
   0x2   :  { %338 = vmatprep.subr.bf16.mxu1 %v377_v0  ;;  %354 = vmatprep.mubr.msk.bf16.mxu1 %vm378_vm0, %v377_v0  ;;  %v369_v4 = vld [vmem:[%s473_s3] sm:$0xff]   ;;  %v363_v5 = vld [vmem:[%s472_s1 + $0x18] sm:$0xff]   ;;  %v370_v6 = vld [vmem:[%s473_s3 + $0x8] sm:$0xff]  }
   0x3   :  { %319 = vmatpush3.bf16.msra.mxu0 %v360_v1  ;;  %339 = vmatpush3.bf16.msra.mxu1 %v369_v4  ;;  %v364_v7 = vld [vmem:[%s472_s1 + $0x20] sm:$0xff]   ;;  %v371_v8 = vld [vmem:[%s473_s3 + $0x10] sm:$0xff]   ;;  %v365_v9 = vld [vmem:[%s472_s1 + $0x28] sm:$0xff]  }
   0x4   :  { %320 = vmatprep.subr.bf16.mxu0 %v377_v0  ;;  %340 = vmatprep.subr.bf16.mxu1 %v377_v0  ;;  %v372_v10 = vld [vmem:[%s473_s3 + $0x18] sm:$0xff]   ;;  %v366_v11 = vld [vmem:[%s472_s1 + $0x30] sm:$0xff]   ;;  %v373_v12 = vld [vmem:[%s473_s3 + $0x20] sm:$0xff]  }
   0x5   :  { %v367_v13 = vld [vmem:[%s472_s1 + $0x38] sm:$0xff]   ;;  %v374_v14 = vld [vmem:[%s473_s3 + $0x28] sm:$0xff]   ;;  %v368_v15 = vld [vmem:[%s474_s0] sm:$0xff]  }
   0x6   :  { %v375_v16 = vld [vmem:[%s473_s3 + $0x30] sm:$0xff]   ;;  %v376_v17 = vld [vmem:[%s473_s3 + $0x38] sm:$0xff]   ;;  %v281_v18 = vld [vmem:[%s475_s2] ss:$0 sm:$0xff] }
   0x7   :  { %321 = vmatpush3.bf16.msra.mxu0 %v361_v2  ;;  %341 = vmatpush3.bf16.msra.mxu1 %v370_v6  ;;  %v299_v28 = vld [vmem:[%s476_s4] ss:$0 sm:$0xff] }
   0x8   :  { %322 = vmatprep.subr.bf16.mxu0 %v377_v0  ;;  %342 = vmatprep.subr.bf16.mxu1 %v377_v0 }
   0xb   :  { %323 = vmatpush3.bf16.msra.mxu0 %v362_v3  ;;  %343 = vmatpush3.bf16.msra.mxu1 %v371_v8 }
   0xc   :  { %324 = vmatprep.subr.bf16.mxu0 %v377_v0  ;;  %344 = vmatprep.subr.bf16.mxu1 %v377_v0 }
   0xf   :  { %325 = vmatpush3.bf16.msra.mxu0 %v363_v5  ;;  %345 = vmatpush3.bf16.msra.mxu1 %v372_v10 }
  0x10   :  { %326 = vmatprep.subr.bf16.mxu0 %v377_v0  ;;  %346 = vmatprep.subr.bf16.mxu1 %v377_v0 }
  0x13   :  { %327 = vmatpush3.bf16.msra.mxu0 %v364_v7  ;;  %347 = vmatpush3.bf16.msra.mxu1 %v373_v12 }
  0x14   :  { %328 = vmatprep.subr.bf16.mxu0 %v377_v0  ;;  %348 = vmatprep.subr.bf16.mxu1 %v377_v0 }
  0x17   :  { %329 = vmatpush3.bf16.msra.mxu0 %v365_v9  ;;  %349 = vmatpush3.bf16.msra.mxu1 %v374_v14 }
  0x18   :  { %330 = vmatprep.subr.bf16.mxu0 %v377_v0  ;;  %350 = vmatprep.subr.bf16.mxu1 %v377_v0 }
  0x1b   :  { %331 = vmatpush3.bf16.msra.mxu0 %v366_v11  ;;  %351 = vmatpush3.bf16.msra.mxu1 %v375_v16 }
  0x1c   :  { %332 = vmatprep.subr.bf16.mxu0 %v377_v0  ;;  %352 = vmatprep.subr.bf16.mxu1 %v377_v0 }
  0x1f   :  { %333 = vmatpush3.bf16.msra.mxu0 %v367_v13  ;;  %353 = vmatpush3.bf16.msra.mxu1 %v376_v17 }
  0x22   :  { %335 = vmatmul.mubr.bf16.vlgmr.msra.gmra.mrb[0].mxu0 %v368_v15 }
  0xf5   :  { %v140_v19 = vpop.f32.mrb[0].mxu0 }
  0xf6   :  { %v141_v20 = vadd.f32 %v281_v18, %v140_v19  ;;  %v336_v21 = vpop.f32.mrb[1].mxu0 }
  0xf7   :  { %v143_v22 = vpop.f32.mrb[2].mxu0 }
  0xf8   :  { %v144_v23 = vadd.f32 %v281_v18, %v143_v22  ;;  %v337_v24 = vpop.f32.mrb[3].mxu0  ;;  %v147_v25 = vmax.f32 %v141_v20, 0.0 }
  0xfa   :  { %v148_v26 = vmax.f32 %v144_v23, 0.0 }
  0xfc   :  { %v151_v27 = vpack.c.bf16 %v148_v26, %v147_v25 }
  0xfe   :  { %355 = vmatmul.mubr.bf16.vlgmr.msra.gmra.mrb[0].mxu1 %v151_v27 }
 0x1d1   :  { %v250_v29 = vpop.f32.mrb[0].mxu1 }
 0x1d2   :  { %v273_v30 = vadd.f32 %v299_v28, %v250_v29  ;;  %v356_v31 = vpop.f32.mrb[1].mxu1 }
 0x1d3   :  { %v253_v32 = vpop.f32.mrb[2].mxu1 }
 0x1d4   :  { %275 = vst [vmem:[%s477_s5] sm:$0xff] %v273_v30  ;;  %v274_v33 = vadd.f32 %v299_v28, %v253_v32  ;;  %v357_v34 = vpop.f32.mrb[3].mxu1 }
 0x1d6   :  { %276 = vst [vmem:[%s477_s5 + $0x8] sm:$0xff] %v274_v33 }

</bundles_post_ra>
